<compile_context>
chip_gen: v5e
topology: v5e:2x2
jax: 0.10.0
libtpu: 0.0.40
codegen_flags: <defaults>
</compile_context>

<pallas_src>
import functools

import jax
import jax.numpy as jnp
from jax.experimental import pallas as pl
from jax.experimental.pallas import tpu as pltpu

LAYERS = [2, 40, 40, 40, 40, 1]
NEG_SLOPE = 0.01  # torch.nn.LeakyReLU default


def _leaky_relu(z):
    return jnp.where(z >= 0, z, NEG_SLOPE * z)


def _mlp_kernel(x_ref,
                w0_ref, b0_ref, w1_ref, b1_ref, w2_ref, b2_ref,
                w3_ref, b3_ref, w4_ref, b4_ref,
                o_ref):
    # x_ref: (2, tile_m) -- feature-major, batch in the lane dimension.
    x = x_ref[...].astype(jnp.float32)
    w0 = w0_ref[...]  # (40, 2)

    # Layer 0 (K=2 contraction): two lane-broadcast multiply-adds on the VPU
    # instead of a heavily padded MXU pass.
    h = (w0[:, 0:1] * x[0:1, :]
         + w0[:, 1:2] * x[1:2, :]
         + b0_ref[...])
    h = _leaky_relu(h)

    # Hidden layers: (40, 40) @ (40, tile_m) on the MXU with f32 accumulation.
    h = _leaky_relu(jnp.dot(w1_ref[...], h, preferred_element_type=jnp.float32)
                    + b1_ref[...])
    h = _leaky_relu(jnp.dot(w2_ref[...], h, preferred_element_type=jnp.float32)
                    + b2_ref[...])
    h = _leaky_relu(jnp.dot(w3_ref[...], h, preferred_element_type=jnp.float32)
                    + b3_ref[...])

    # Output layer (no activation): (1, 40) @ (40, tile_m) -> (1, tile_m), lane-dense.
    out = jnp.dot(w4_ref[...], h, preferred_element_type=jnp.float32) + b4_ref[...]
    o_ref[...] = out.astype(o_ref.dtype)


def init_params(key, layers=LAYERS):
    """Deterministic init mirroring the PyTorch module:
    weight ~ Normal(0, sqrt(2/(in+out))) in torch (out, in) layout, bias = 0."""
    params = []
    for i in range(len(layers) - 1):
        in_dim, out_dim = layers[i], layers[i + 1]
        key, sub = jax.random.split(key)
        std = jnp.sqrt(2.0 / (in_dim + out_dim)).astype(jnp.float32)
        w = std * jax.random.normal(sub, (out_dim, in_dim), dtype=jnp.float32)
        b = jnp.zeros((out_dim, 1), dtype=jnp.float32)
        params.append((w, b))
    return params


@functools.partial(jax.jit, static_argnames=("tile_m",))
def dense_nn_forward(x, params, tile_m=1024):
    """x: (N, 2) float32 -> (N, 1) float32."""
    n, in_dim = x.shape
    assert in_dim == LAYERS[0]
    out_dim = LAYERS[-1]

    # Feature-major view (layout plumbing in the wrapper, not compute).
    xt = x.T  # (in_dim, N)

    # Tile the batch (lane) dimension; no explicit padding of x.
    n_lanepad = pl.cdiv(n, 128) * 128
    tm = min(tile_m, n_lanepad)
    if n_lanepad >= 256 and pl.cdiv(n, tm) == 1:
        # Keep >= 2 parallel grid steps so both TensorCores on v7x get work.
        tm = pl.cdiv(n_lanepad, 256) * 128
    grid = (pl.cdiv(n, tm),)

    # Flatten params into an ordered arg list: w0, b0, w1, b1, ...
    flat = []
    for w, b in params:
        flat.extend([w, b])

    def _full_spec(arr):
        # Full-array block, replicated across the batch grid (fetched once).
        return pl.BlockSpec(arr.shape, lambda i: (0, 0))

    in_specs = [pl.BlockSpec((in_dim, tm), lambda i: (0, i))]
    in_specs += [_full_spec(a) for a in flat]

    param_bytes = sum(int(a.size) * a.dtype.itemsize for a in flat)
    cost = pl.CostEstimate(
        flops=2 * n * sum(LAYERS[i] * LAYERS[i + 1] for i in range(len(LAYERS) - 1)),
        transcendentals=0,
        bytes_accessed=int(x.size) * x.dtype.itemsize + n * out_dim * 4 + param_bytes,
    )

    out = pl.pallas_call(
        _mlp_kernel,
        out_shape=jax.ShapeDtypeStruct((out_dim, n), jnp.float32),
        grid_spec=pltpu.PrefetchScalarGridSpec(
            num_scalar_prefetch=0,
            grid=grid,
            in_specs=in_specs,
            out_specs=pl.BlockSpec((out_dim, tm), lambda i: (0, i)),
        ),
        compiler_params=pltpu.CompilerParams(
            dimension_semantics=("parallel",)),
        cost_estimate=cost,
    )(xt, *flat)

    # (1, N) lane-dense result -> (N, 1) to match the torch module's output layout.
    return out.T


def _reference_forward(x, params):
    h = x
    for i, (w, b) in enumerate(params):
        h = h @ w.T + b[:, 0]
        if i < len(params) - 1:
            h = jnp.where(h >= 0, h, NEG_SLOPE * h)
    return h


if __name__ == "__main__":
    key = jax.random.PRNGKey(0)
    pkey, xkey = jax.random.split(key)

    params = init_params(pkey)

    # Small batch of (x, t)-like 2-feature inputs.
    N = 256
    x = jax.random.normal(xkey, (N, LAYERS[0]), dtype=jnp.float32)

    out = dense_nn_forward(x, params)
    out = jax.block_until_ready(out)

    ref = _reference_forward(x, params)
    assert out.shape == (N, LAYERS[-1])
    assert jnp.allclose(out, ref, atol=1e-5, rtol=1e-5), "mismatch vs. reference"

    print("KERNEL_OK")
</pallas_src>

<mosaic_0001>
module attributes {stable_mosaic.version = 11 : i64} {
  func.func @_mlp_kernel(%arg0: i32, %arg1: memref<2x128xf32, #tpu.memory_space<vmem>>, %arg2: memref<40x2xf32, #tpu.memory_space<vmem>>, %arg3: memref<40x1xf32, #tpu.memory_space<vmem>>, %arg4: memref<40x40xf32, #tpu.memory_space<vmem>>, %arg5: memref<40x1xf32, #tpu.memory_space<vmem>>, %arg6: memref<40x40xf32, #tpu.memory_space<vmem>>, %arg7: memref<40x1xf32, #tpu.memory_space<vmem>>, %arg8: memref<40x40xf32, #tpu.memory_space<vmem>>, %arg9: memref<40x1xf32, #tpu.memory_space<vmem>>, %arg10: memref<1x40xf32, #tpu.memory_space<vmem>>, %arg11: memref<1x1xf32, #tpu.memory_space<vmem>>, %arg12: memref<1x128xf32, #tpu.memory_space<vmem>>) attributes {dimension_semantics = [#tpu.dimension_semantics<parallel>], iteration_bounds = array<i64: 2>, scalar_prefetch = 0 : i64, scratch_operands = 0 : i64, tpu.core_type = #tpu.core_type<tc>, window_params = [{transform_indices = @transform_0, window_bounds = array<i64: 2, 128>}, {pipeline_mode = #tpu.pipeline_mode<synchronous>, transform_indices = @transform_1, window_bounds = array<i64: 40, 2>}, {pipeline_mode = #tpu.pipeline_mode<synchronous>, transform_indices = @transform_2, window_bounds = array<i64: 40, 1>}, {pipeline_mode = #tpu.pipeline_mode<synchronous>, transform_indices = @transform_3, window_bounds = array<i64: 40, 40>}, {pipeline_mode = #tpu.pipeline_mode<synchronous>, transform_indices = @transform_4, window_bounds = array<i64: 40, 1>}, {pipeline_mode = #tpu.pipeline_mode<synchronous>, transform_indices = @transform_5, window_bounds = array<i64: 40, 40>}, {pipeline_mode = #tpu.pipeline_mode<synchronous>, transform_indices = @transform_6, window_bounds = array<i64: 40, 1>}, {pipeline_mode = #tpu.pipeline_mode<synchronous>, transform_indices = @transform_7, window_bounds = array<i64: 40, 40>}, {pipeline_mode = #tpu.pipeline_mode<synchronous>, transform_indices = @transform_8, window_bounds = array<i64: 40, 1>}, {pipeline_mode = #tpu.pipeline_mode<synchronous>, transform_indices = @transform_9, window_bounds = array<i64: 1, 40>}, {pipeline_mode = #tpu.pipeline_mode<synchronous>, transform_indices = @transform_10, window_bounds = array<i64: 1, 1>}, {transform_indices = @transform_11, window_bounds = array<i64: 1, 128>}]} {
    %c0 = arith.constant 0 : index
    %c0_0 = arith.constant 0 : index
    %0 = vector.load %arg1[%c0, %c0_0] : memref<2x128xf32, #tpu.memory_space<vmem>>, vector<2x128xf32>
    %c0_1 = arith.constant 0 : index
    %c0_2 = arith.constant 0 : index
    %1 = vector.load %arg2[%c0_1, %c0_2] : memref<40x2xf32, #tpu.memory_space<vmem>>, vector<40x2xf32>
    %2 = vector.extract_strided_slice %1 {offsets = [0, 0], sizes = [40, 1], strides = [1, 1]} : vector<40x2xf32> to vector<40x1xf32>
    %3 = vector.extract_strided_slice %0 {offsets = [0, 0], sizes = [1, 128], strides = [1, 1]} : vector<2x128xf32> to vector<1x128xf32>
    %4 = vector.broadcast %2 : vector<40x1xf32> to vector<40x128xf32>
    %5 = vector.broadcast %3 : vector<1x128xf32> to vector<40x128xf32>
    %6 = arith.mulf %4, %5 : vector<40x128xf32>
    %7 = vector.extract_strided_slice %1 {offsets = [0, 1], sizes = [40, 1], strides = [1, 1]} : vector<40x2xf32> to vector<40x1xf32>
    %8 = vector.extract_strided_slice %0 {offsets = [1, 0], sizes = [1, 128], strides = [1, 1]} : vector<2x128xf32> to vector<1x128xf32>
    %9 = vector.broadcast %7 : vector<40x1xf32> to vector<40x128xf32>
    %10 = vector.broadcast %8 : vector<1x128xf32> to vector<40x128xf32>
    %11 = arith.mulf %9, %10 : vector<40x128xf32>
    %12 = arith.addf %6, %11 : vector<40x128xf32>
    %c0_3 = arith.constant 0 : index
    %c0_4 = arith.constant 0 : index
    %13 = vector.load %arg3[%c0_3, %c0_4] : memref<40x1xf32, #tpu.memory_space<vmem>>, vector<40x1xf32>
    %14 = vector.broadcast %13 : vector<40x1xf32> to vector<40x128xf32>
    %15 = arith.addf %12, %14 : vector<40x128xf32>
    %cst = arith.constant 0.000000e+00 : f32
    %16 = vector.broadcast %cst : f32 to vector<40x128xf32>
    %17 = arith.cmpf oge, %15, %16 : vector<40x128xf32>
    %cst_5 = arith.constant 0.00999999977 : f32
    %18 = vector.broadcast %cst_5 : f32 to vector<40x128xf32>
    %19 = arith.mulf %18, %15 : vector<40x128xf32>
    %20 = arith.select %17, %15, %19 : vector<40x128xi1>, vector<40x128xf32>
    %c0_6 = arith.constant 0 : index
    %c0_7 = arith.constant 0 : index
    %21 = vector.load %arg4[%c0_6, %c0_7] : memref<40x40xf32, #tpu.memory_space<vmem>>, vector<40x40xf32>
    %cst_8 = arith.constant dense<0.000000e+00> : vector<40x128xf32>
    %22 = tpu.matmul %21, %20, %cst_8 {dimension_numbers = #tpu.dot_dimension_numbers<[1], [0], [0], [1], [0, 0, 1, 1], [], []>} : vector<40x40xf32>, vector<40x128xf32>, vector<40x128xf32> -> vector<40x128xf32>
    %c0_9 = arith.constant 0 : index
    %c0_10 = arith.constant 0 : index
    %23 = vector.load %arg5[%c0_9, %c0_10] : memref<40x1xf32, #tpu.memory_space<vmem>>, vector<40x1xf32>
    %24 = vector.broadcast %23 : vector<40x1xf32> to vector<40x128xf32>
    %25 = arith.addf %22, %24 : vector<40x128xf32>
    %cst_11 = arith.constant 0.000000e+00 : f32
    %26 = vector.broadcast %cst_11 : f32 to vector<40x128xf32>
    %27 = arith.cmpf oge, %25, %26 : vector<40x128xf32>
    %cst_12 = arith.constant 0.00999999977 : f32
    %28 = vector.broadcast %cst_12 : f32 to vector<40x128xf32>
    %29 = arith.mulf %28, %25 : vector<40x128xf32>
    %30 = arith.select %27, %25, %29 : vector<40x128xi1>, vector<40x128xf32>
    %c0_13 = arith.constant 0 : index
    %c0_14 = arith.constant 0 : index
    %31 = vector.load %arg6[%c0_13, %c0_14] : memref<40x40xf32, #tpu.memory_space<vmem>>, vector<40x40xf32>
    %cst_15 = arith.constant dense<0.000000e+00> : vector<40x128xf32>
    %32 = tpu.matmul %31, %30, %cst_15 {dimension_numbers = #tpu.dot_dimension_numbers<[1], [0], [0], [1], [0, 0, 1, 1], [], []>} : vector<40x40xf32>, vector<40x128xf32>, vector<40x128xf32> -> vector<40x128xf32>
    %c0_16 = arith.constant 0 : index
    %c0_17 = arith.constant 0 : index
    %33 = vector.load %arg7[%c0_16, %c0_17] : memref<40x1xf32, #tpu.memory_space<vmem>>, vector<40x1xf32>
    %34 = vector.broadcast %33 : vector<40x1xf32> to vector<40x128xf32>
    %35 = arith.addf %32, %34 : vector<40x128xf32>
    %cst_18 = arith.constant 0.000000e+00 : f32
    %36 = vector.broadcast %cst_18 : f32 to vector<40x128xf32>
    %37 = arith.cmpf oge, %35, %36 : vector<40x128xf32>
    %cst_19 = arith.constant 0.00999999977 : f32
    %38 = vector.broadcast %cst_19 : f32 to vector<40x128xf32>
    %39 = arith.mulf %38, %35 : vector<40x128xf32>
    %40 = arith.select %37, %35, %39 : vector<40x128xi1>, vector<40x128xf32>
    %c0_20 = arith.constant 0 : index
    %c0_21 = arith.constant 0 : index
    %41 = vector.load %arg8[%c0_20, %c0_21] : memref<40x40xf32, #tpu.memory_space<vmem>>, vector<40x40xf32>
    %cst_22 = arith.constant dense<0.000000e+00> : vector<40x128xf32>
    %42 = tpu.matmul %41, %40, %cst_22 {dimension_numbers = #tpu.dot_dimension_numbers<[1], [0], [0], [1], [0, 0, 1, 1], [], []>} : vector<40x40xf32>, vector<40x128xf32>, vector<40x128xf32> -> vector<40x128xf32>
    %c0_23 = arith.constant 0 : index
    %c0_24 = arith.constant 0 : index
    %43 = vector.load %arg9[%c0_23, %c0_24] : memref<40x1xf32, #tpu.memory_space<vmem>>, vector<40x1xf32>
    %44 = vector.broadcast %43 : vector<40x1xf32> to vector<40x128xf32>
    %45 = arith.addf %42, %44 : vector<40x128xf32>
    %cst_25 = arith.constant 0.000000e+00 : f32
    %46 = vector.broadcast %cst_25 : f32 to vector<40x128xf32>
    %47 = arith.cmpf oge, %45, %46 : vector<40x128xf32>
    %cst_26 = arith.constant 0.00999999977 : f32
    %48 = vector.broadcast %cst_26 : f32 to vector<40x128xf32>
    %49 = arith.mulf %48, %45 : vector<40x128xf32>
    %50 = arith.select %47, %45, %49 : vector<40x128xi1>, vector<40x128xf32>
    %c0_27 = arith.constant 0 : index
    %c0_28 = arith.constant 0 : index
    %51 = vector.load %arg10[%c0_27, %c0_28] : memref<1x40xf32, #tpu.memory_space<vmem>>, vector<1x40xf32>
    %cst_29 = arith.constant dense<0.000000e+00> : vector<1x128xf32>
    %52 = tpu.matmul %51, %50, %cst_29 {dimension_numbers = #tpu.dot_dimension_numbers<[1], [0], [0], [1], [0, 0, 1, 1], [], []>} : vector<1x40xf32>, vector<40x128xf32>, vector<1x128xf32> -> vector<1x128xf32>
    %c0_30 = arith.constant 0 : index
    %c0_31 = arith.constant 0 : index
    %53 = vector.load %arg11[%c0_30, %c0_31] : memref<1x1xf32, #tpu.memory_space<vmem>>, vector<1x1xf32>
    %54 = vector.broadcast %53 : vector<1x1xf32> to vector<1x128xf32>
    %55 = arith.addf %52, %54 : vector<1x128xf32>
    %c0_32 = arith.constant 0 : index
    %c0_33 = arith.constant 0 : index
    %56 = vector.load %arg12[%c0_32, %c0_33] : memref<1x128xf32, #tpu.memory_space<vmem>>, vector<1x128xf32>
    tpu.vector_store %arg12[%c0_32, %c0_33], %55 {strides = array<i32>} : memref<1x128xf32, #tpu.memory_space<vmem>>, vector<1x128xf32>,
    return
  }
  func.func @transform_0(%arg0: i32) -> (i32, i32) {
    %c0_i32 = arith.constant 0 : i32
    %c0_i32_0 = arith.constant 0 : i32
    return %c0_i32, %arg0 : i32, i32
  }
  func.func @transform_1(%arg0: i32) -> (i32, i32) {
    %c0_i32 = arith.constant 0 : i32
    %c0_i32_0 = arith.constant 0 : i32
    %c0_i32_1 = arith.constant 0 : i32
    return %c0_i32, %c0_i32_0 : i32, i32
  }
  func.func @transform_2(%arg0: i32) -> (i32, i32) {
    %c0_i32 = arith.constant 0 : i32
    %c0_i32_0 = arith.constant 0 : i32
    %c0_i32_1 = arith.constant 0 : i32
    return %c0_i32, %c0_i32_0 : i32, i32
  }
  func.func @transform_3(%arg0: i32) -> (i32, i32) {
    %c0_i32 = arith.constant 0 : i32
    %c0_i32_0 = arith.constant 0 : i32
    %c0_i32_1 = arith.constant 0 : i32
    return %c0_i32, %c0_i32_0 : i32, i32
  }
  func.func @transform_4(%arg0: i32) -> (i32, i32) {
    %c0_i32 = arith.constant 0 : i32
    %c0_i32_0 = arith.constant 0 : i32
    %c0_i32_1 = arith.constant 0 : i32
    return %c0_i32, %c0_i32_0 : i32, i32
  }
  func.func @transform_5(%arg0: i32) -> (i32, i32) {
    %c0_i32 = arith.constant 0 : i32
    %c0_i32_0 = arith.constant 0 : i32
    %c0_i32_1 = arith.constant 0 : i32
    return %c0_i32, %c0_i32_0 : i32, i32
  }
  func.func @transform_6(%arg0: i32) -> (i32, i32) {
    %c0_i32 = arith.constant 0 : i32
    %c0_i32_0 = arith.constant 0 : i32
    %c0_i32_1 = arith.constant 0 : i32
    return %c0_i32, %c0_i32_0 : i32, i32
  }
  func.func @transform_7(%arg0: i32) -> (i32, i32) {
    %c0_i32 = arith.constant 0 : i32
    %c0_i32_0 = arith.constant 0 : i32
    %c0_i32_1 = arith.constant 0 : i32
    return %c0_i32, %c0_i32_0 : i32, i32
  }
  func.func @transform_8(%arg0: i32) -> (i32, i32) {
    %c0_i32 = arith.constant 0 : i32
    %c0_i32_0 = arith.constant 0 : i32
    %c0_i32_1 = arith.constant 0 : i32
    return %c0_i32, %c0_i32_0 : i32, i32
  }
  func.func @transform_9(%arg0: i32) -> (i32, i32) {
    %c0_i32 = arith.constant 0 : i32
    %c0_i32_0 = arith.constant 0 : i32
    %c0_i32_1 = arith.constant 0 : i32
    return %c0_i32, %c0_i32_0 : i32, i32
  }
  func.func @transform_10(%arg0: i32) -> (i32, i32) {
    %c0_i32 = arith.constant 0 : i32
    %c0_i32_0 = arith.constant 0 : i32
    %c0_i32_1 = arith.constant 0 : i32
    return %c0_i32, %c0_i32_0 : i32, i32
  }
  func.func @transform_11(%arg0: i32) -> (i32, i32) {
    %c0_i32 = arith.constant 0 : i32
    %c0_i32_0 = arith.constant 0 : i32
    return %c0_i32, %arg0 : i32, i32
  }
}

</mosaic_0001>

<bundles_post_ra>
// kernel: dense_nn_forward.1
= control target key start
LH: loop header
LB: loop body
LE: loop exit
PB: predicated region body
PF: predicated region fallthrough
CT: control target
= control target key end

     0   :  { %s1319_s0 = inlined_call_operand.vmem [shape: f32[2,256], index: 0, kind: input, shape index: {}]   ;;  %s1320_s1 = inlined_call_operand.vmem [shape: f32[40,2], index: 1, kind: input, shape index: {}]   ;;  %s1321_s2 = inlined_call_operand.vmem [shape: f32[40,1], index: 2, kind: input, shape index: {}]   ;;  %s1322_s3 = inlined_call_operand.vmem [shape: f32[40,40], index: 3, kind: input, shape index: {}]   ;;  %s1323_s4 = inlined_call_operand.vmem [shape: f32[40,1], index: 4, kind: input, shape index: {}]   ;;  %s1324_s5 = inlined_call_operand.vmem [shape: f32[40,40], index: 5, kind: input, shape index: {}]   ;;  %s1325_s6 = inlined_call_operand.vmem [shape: f32[40,1], index: 6, kind: input, shape index: {}]   ;;  %s1326_s7 = inlined_call_operand.vmem [shape: f32[40,40], index: 7, kind: input, shape index: {}]   ;;  %s1327_s8 = inlined_call_operand.vmem [shape: f32[40,1], index: 8, kind: input, shape index: {}]   ;;  %s1328_s9 = inlined_call_operand.vmem [shape: f32[1,40], index: 9, kind: input, shape index: {}]   ;;  %s1329_s10 = inlined_call_operand.<no memory space> [shape: f32[1,1], index: 10, kind: input, shape index: {}]   ;;  %s1330_s11 = inlined_call_operand.hbm [shape: f32[1,256], index: 11, kind: output, shape index: {}]  }
   0x1   :  { %v16_v0 = vstv %s1329_s10 }
   0x2   :  { %17 = vst [vmem:[#allocation2] sm:$0x1] %v16_v0 }
   0x3   :  { %18 = vsyncpa [#allocation4], 0 }
   0x4   :  { %20 = vsyncpa [#allocation4 + $0x1], 0  ;;  %s1095_s19 = smov 0   ;;  %s1097_s20 = smov 0  }
   0x5   :  { %s1099_s21 = smov 0   ;;  %s1101_s22 = smov 0  }
   0x6 LB: > { %s1116_s10 = sadd.s32 4294967295, %s1028_s22   ;;  %s893_s23 = sadd.s32 4294967294, %s1028_s22   ;;  %s1028_s22 = sphi %s1101_s22, %s1336_s22   ;;  %s1024_s21 = sphi %s1099_s21, %s1335_s21   ;;  %s1020_s20 = sphi %s1097_s20, %s1334_s20   ;;  %s1016_s19 = sphi %s1095_s19, %s1333_s19  }
   0x7   : > { %s1120_s24 = sadd.s32 1, %s1028_s22   ;;  %s269_s25 = sadd.s32 1, %s1024_s21 }
   0x8   : > { %s266_s26 = ssub.s32 %s1028_s22, %s1120_s24  ;;  %p279_p0 = scmp.ne.s32.totalorder %s1024_s21, %s1020_s20 }
   0x9   : > { %p267_p1 = scmp.eq.s32.totalorder %s266_s26, 0  ;;  %p280_p2 = scmp.eq.s32.totalorder %s1116_s10, 1 }
   0xa   : > { %p285_p3 = scmp.ne.s32.totalorder %s1020_s20, %s1016_s19  ;;  %p286_p4 = scmp.eq.s32.totalorder %s893_s23, 1 }
   0xb   : > { %s1131_s27 = scalar_select %p267_p1, %s1024_s21, %s269_s25  }
   0xc   : > { %p1133_p5 = por %p280_p2, %p279_p0  ;;  %p1137_p6 = por %p286_p4, %p285_p3 }
   0xd   : > { %p896_p7 = scmp.ge.s32.totalorder %s1028_s22, 1  ;;  %p341_p8 = scmp.lt.s32.totalorder %s1028_s22, 3 }
   0xf   : > { %p342_p9 = pnand %p896_p7, %p341_p8 }
  0x10   : > { %p379_p10 = scmp.lt.s32.totalorder (!%p342_p9), %s1116_s10, 1  ;;  %s834_s13 = scalar_lea.hbm (!%p342_p9), %s1330_s11, %s1116_s10 }
  0x11   : > { %345 = sbr.rel (%p342_p9) target bundleno = 843 (0x34b), region = 64  ;;  %s838_s16 = sshll.u32 (!%p342_p9), %s834_s13, 4  ;;  %s839_s16 = int_to_ptr.hbm [resolvable:$true] %s838_s16 }
  0x12   : > { %s986_s30 = scalar_lea.hbm (!%p342_p9), %s1330_s11, 2 }
  0x16   : > { %v388_v1 = vld [vmem:[%s1320_s1 + $0x20] sm:$0xff]  ;;  %v387_v2 = vld [vmem:[%s1320_s1 + $0x18] sm:$0xff]  ;;  %v386_v3 = vld [vmem:[%s1320_s1 + $0x10] sm:$0xff]  ;;  %v1030_v4 = vmov 0   ;;  %v1031_v5 = vmov 1   ;;  %s380_s17 = scalar_select %p379_p10, %s1116_s10, 1 }
  0x17   : > { %961 = vset.pattern.permute.xlu2 %v1030_v4  ;;  %959 = vset.pattern.permute.xlu1 %v1030_v4  ;;  %v385_v6 = vld [vmem:[%s1320_s1 + $0x8] sm:$0xff]  ;;  %v455_v7 = vld [vmem:[%s1321_s2 + $0x20] sm:$0xff]  ;;  %v454_v9 = vld [vmem:[%s1321_s2 + $0x18] sm:$0xff]  ;;  %vm536_vm5 = vcmask 326656  }
  0x18   : > { %957 = vset.pattern.permute.xlu0 %v1030_v4  ;;  %406 = vperm.xlu1 %959, %v387_v2   ;;  %v384_v8 = vld [vmem:[%s1320_s1] sm:$0xff]  ;;  %v453_v10 = vld [vmem:[%s1321_s2 + $0x10] sm:$0xff]  ;;  %v452_v12 = vld [vmem:[%s1321_s2 + $0x8] sm:$0xff]  ;;  %s897_s18 = sshll.u32 %s380_s17, 1 }
  0x19   : > { %411 = vperm.xlu0 %957, %v388_v1   ;;  %401 = vperm.xlu2 %961, %v386_v3   ;;  %v451_v11 = vld [vmem:[%s1321_s2] sm:$0xff]  ;;  %v509_v15 = vld [vmem:[%s1323_s4 + $0x18] sm:$0xff]  ;;  %v508_v16 = vld [vmem:[%s1323_s4 + $0x10] sm:$0xff]  ;;  %s382_s26 = scalar_lea.vmem %s1319_s0, %s897_s18  ;;  %s980_s18 = sshra.s32 %s839_s16, 4  ;;  %s981_s18 = int_to_ptr.hbm [resolvable:$true] %s980_s18 }
  0x1a   : > { %v510_v13 = vld [vmem:[%s1323_s4 + $0x20] sm:$0xff]  ;;  %v606_v17 = vld [vmem:[%s1325_s6 + $0x10] sm:$0xff]  ;;  %v507_v18 = vld [vmem:[%s1323_s4 + $0x8] sm:$0xff]  ;;  %s982_s23 = scalar_lea.hbm %s981_s18, 1  ;;  %p987_p0 = scmp.lt.s32.totalorder %s981_s18, %s1330_s11 }
  0x1b   : > { %v506_v14 = vld [vmem:[%s1323_s4] sm:$0xff]  ;;  %v607_v21 = vld [vmem:[%s1325_s6 + $0x18] sm:$0xff]  ;;  %v605_v22 = vld [vmem:[%s1325_s6 + $0x8] sm:$0xff]  ;;  %p983_p11 = scmp.ne.s32.totalorder %s981_s18, %s982_s23  ;;  %p988_p1 = scmp.lt.s32.totalorder %s986_s30, %s982_s23 }
  0x1c   : > { %v608_v19 = vld [vmem:[%s1325_s6 + $0x20] sm:$0xff]  ;;  %v702_v23 = vld [vmem:[%s1327_s8 + $0x8] sm:$0xff]  ;;  %v704_v25 = vld [vmem:[%s1327_s8 + $0x18] sm:$0xff] }
  0x1d   : > { %v705_v20 = vld [vmem:[%s1327_s8 + $0x20] sm:$0xff]  ;;  %v703_v26 = vld [vmem:[%s1327_s8 + $0x10] sm:$0xff]  ;;  %p984_p12 = pnand %p983_p11, %p1133_p5  ;;  %p989_p2 = por %p988_p1, %p987_p0 }
  0x1e   : > { %v604_v24 = vld [vmem:[%s1325_s6] sm:$0xff] }
  0x1f   : > { %v701_v27 = vld [vmem:[%s1327_s8] sm:$0xff]  ;;  %p985_p13 = pneg %p984_p12 }
  0x20   : > { %960 = vset.pattern.permute.xlu1 %v1031_v5  ;;  %v794_v28 = vld [vmem:[#allocation2] sm:$0x1] }
  0x21   : > { %958 = vset.pattern.permute.xlu0 %v1031_v5  ;;  %962 = vset.pattern.permute.xlu2 %v1031_v5  ;;  %v383_v35 = vld [vmem:[%s382_s26] sm:$0x3]  ;;  %s377_s26 = sand.u32 1, %s1020_s20   ;;  %p990_p3 = pnand %p989_p2, %p985_p13 }
  0x22   : > { %437 = vperm.xlu0 %958, %v388_v1   ;;  %433 = vperm.xlu1 %960, %v387_v2   ;;  %v440_v36 = vperm.slane %v383_v35, 1  ;;  %v414_v38 = vperm.slane %v383_v35, 0  ;;  %s378_s14 = scalar_lea.vmem [#allocation3], %s377_s26  ;;  %s826_s17 = scalar_lea.sflag [#allocation4], %s377_s26 }
  0x23   : > { %429 = vperm.xlu2 %962, %v386_v3   ;;  %s836_s15 = sshll.u32 %s378_s14, 4  ;;  %s837_s15 = int_to_ptr.vmem [resolvable:$true] %s836_s15 }
  0x2a   : > { %963 = vset.pattern.permute.xlu1 %v1030_v4  ;;  %425 = vperm.xlu0 %958, %v385_v6  }
  0x2b   : > { %964 = vset.pattern.permute.xlu2 %v1030_v4  ;;  %478 = vperm.xlu1 %963, %v455_v7  }
  0x2c   : > { %396 = vperm.xlu2 %964, %v385_v6  }
  0x32   : > { %421 = vperm.xlu0 %958, %v384_v8  }
  0x33   : > { %473 = vperm.xlu1 %963, %v454_v9  }
  0x34   : > { %391 = vperm.xlu2 %964, %v384_v8  }
  0x3a   : > { %965 = vset.pattern.permute.xlu0 %v1030_v4 }
  0x3b   : > { %468 = vperm.xlu1 %963, %v453_v10   ;;  %458 = vperm.xlu0 %965, %v451_v11  }
  0x3c   : > { %463 = vperm.xlu2 %964, %v452_v12   ;;  %v501_v12 = vld [vmem:[%s1322_s3] sm:$0xff] }
  0x43   : > { %533 = vperm.xlu1 %963, %v510_v13   ;;  %513 = vperm.xlu0 %965, %v506_v14   ;;  %v502_v14 = vld [vmem:[%s1322_s3 + $0x8] sm:$0xff] }
  0x44   : > { %528 = vperm.xlu2 %964, %v509_v15   ;;  %v503_v15 = vld [vmem:[%s1322_s3 + $0x10] sm:$0xff] }
  0x4b   : > { %523 = vperm.xlu1 %963, %v508_v16   ;;  %621 = vperm.xlu0 %965, %v606_v17   ;;  %v504_v16 = vld [vmem:[%s1322_s3 + $0x18] sm:$0xff]  ;;  %v505_v17 = vld [vmem:[%s1322_s3 + $0x20] sm:$0xff] }
  0x4c   : > { %518 = vperm.xlu2 %964, %v507_v18  }
  0x53   : > { %631 = vperm.xlu1 %963, %v608_v19   ;;  %728 = vperm.xlu0 %965, %v705_v20  }
  0x54   : > { %626 = vperm.xlu2 %964, %v607_v21  }
  0x5b   : > { %616 = vperm.xlu1 %963, %v605_v22   ;;  %713 = vperm.xlu0 %965, %v702_v23  }
  0x5c   : > { %611 = vperm.xlu2 %964, %v604_v24  }
  0x63   : > { %723 = vperm.xlu1 %963, %v704_v25  }
  0x64   : > { %718 = vperm.xlu2 %964, %v703_v26  }
  0x6b   : > { %708 = vperm.xlu1 %963, %v701_v27  }
  0x6c   : > { %797 = vperm.xlu2 %964, %v794_v28  }
  0x73   : > { %v402_v29 = vpop.permute.xlu2 %401 }
  0x74   : > { %v417_v56 = vmul.f32 %v414_v38, %v402_v29 }
  0x7d   : > { %v430_v32 = vpop.permute.xlu2 %429 }
  0x7e   : > { %v443_v57 = vmul.f32 %v440_v36, %v430_v32 }
  0x80   : > { %v448_v1 = vadd.f32 %v443_v57, %v417_v56 }
  0x86   : > { %v397_v37 = vpop.permute.xlu2 %396 }
  0x87   : > { %v416_v50 = vmul.f32 %v414_v38, %v397_v37 }
  0x8a   : > { %v407_v30 = vpop.permute.xlu1 %406 }
  0x8b   : > { %v412_v31 = vpop.permute.xlu0 %411  ;;  %v418_v48 = vmul.f32 %v414_v38, %v407_v30 }
  0x8c   : > { %v419_v40 = vmul.f32 %v414_v38, %v412_v31 }
  0x8e   : > { %v392_v47 = vpop.permute.xlu2 %391 }
  0x8f   : > { %v415_v61 = vmul.f32 %v414_v38, %v392_v47  ;;  %v603_v47 = vld [vmem:[%s1324_s5 + $0x20] sm:$0xff] }
  0x94   : > { %v438_v33 = vpop.permute.xlu0 %437  ;;  %v434_v34 = vpop.permute.xlu1 %433 }
  0x95   : > { %v445_v39 = vmul.f32 %v440_v36, %v438_v33  ;;  %v444_v45 = vmul.f32 %v440_v36, %v434_v34 }
  0x96   : > { %v464_v63 = vpop.permute.xlu2 %463 }
  0x97   : > { %v450_v42 = vadd.f32 %v445_v39, %v419_v40  ;;  %v449_v53 = vadd.f32 %v444_v45, %v418_v48  ;;  %v601_v45 = vld [vmem:[%s1324_s5 + $0x10] sm:$0xff] }
  0x9c   : > { %v426_v41 = vpop.permute.xlu0 %425 }
  0x9d   : > { %v479_v43 = vpop.permute.xlu1 %478  ;;  %v442_v51 = vmul.f32 %v440_v36, %v426_v41 }
  0x9e   : > { %v485_v44 = vadd.f32 %v479_v43, %v450_v42  ;;  %v529_v22 = vpop.permute.xlu2 %528  ;;  %v599_v42 = vld [vmem:[%s1324_s5] sm:$0xff] }
  0x9f   : > { %v447_v58 = vadd.f32 %v442_v51, %v416_v50 }
  0xa0   : > { %vm490_vm0 = vcmp.ge.f32.partialorder %v485_v44, 0.0  ;;  %v495_v46 = vmul.f32 0.01, %v485_v44 }
  0xa1   : > { %v482_v0 = vadd.f32 %v464_v63, %v447_v58 }
  0xa2   : > { %v500_v49 = vsel %vm490_vm0, %v485_v44, %v495_v46  ;;  %v600_v44 = vld [vmem:[%s1324_s5 + $0x8] sm:$0xff]  ;;  %v602_v46 = vld [vmem:[%s1324_s5 + $0x18] sm:$0xff] }
  0xa3   : > { %563 = vmatpush.msra.mxu0 %v500_v49  ;;  %v492_v8 = vmul.f32 0.01, %v482_v0  ;;  %vm487_vm3 = vcmp.ge.f32.partialorder %v482_v0, 0.0 }
  0xa4   : > { %v422_v52 = vpop.permute.xlu0 %421 }
  0xa5   : > { %v474_v54 = vpop.permute.xlu1 %473  ;;  %v441_v59 = vmul.f32 %v440_v36, %v422_v52  ;;  %v497_v11 = vsel %vm487_vm3, %v482_v0, %v492_v8  ;;  %v696_v8 = vld [vmem:[%s1326_s7] sm:$0xff] }
  0xa6   : > { %v484_v55 = vadd.f32 %v474_v54, %v449_v53  ;;  %v519_v29 = vpop.permute.xlu2 %518 }
  0xa7   : > { %v446_v2 = vadd.f32 %v441_v59, %v415_v61 }
  0xa8   : > { %vm489_vm1 = vcmp.ge.f32.partialorder %v484_v55, 0.0  ;;  %v494_v60 = vmul.f32 0.01, %v484_v55 }
  0xaa   : > { %v499_v62 = vsel %vm489_vm1, %v484_v55, %v494_v60 }
  0xab   : > { %564 = vmatpush.msra.mxu0 %v499_v62 }
  0xad   : > { %v469_v3 = vpop.permute.xlu1 %468  ;;  %v459_v4 = vpop.permute.xlu0 %458 }
  0xae   : > { %v483_v5 = vadd.f32 %v469_v3, %v448_v1  ;;  %v481_v6 = vadd.f32 %v459_v4, %v446_v2  ;;  %v627_v53 = vpop.permute.xlu2 %626 }
  0xb0   : > { %vm488_vm2 = vcmp.ge.f32.partialorder %v483_v5, 0.0  ;;  %v493_v7 = vmul.f32 0.01, %v483_v5  ;;  %v491_v10 = vmul.f32 0.01, %v481_v6  ;;  %vm486_vm4 = vcmp.ge.f32.partialorder %v481_v6, 0.0 }
  0xb2   : > { %v498_v9 = vsel %vm488_vm2, %v483_v5, %v493_v7  ;;  %v496_v13 = vsel %vm486_vm4, %v481_v6, %v491_v10  ;;  %v697_v10 = vld [vmem:[%s1326_s7 + $0x8] sm:$0xff] }
  0xb3   : > { %565 = vmatpush.msra.mxu0 %v498_v9 }
  0xb5   : > { %566 = vmatpush.msra.mxu0 %v497_v11  ;;  %v534_v21 = vpop.permute.xlu1 %533  ;;  %v514_v33 = vpop.permute.xlu0 %513  ;;  %v698_v11 = vld [vmem:[%s1326_s7 + $0x10] sm:$0xff] }
  0xb6   : > { %v612_v63 = vpop.permute.xlu2 %611 }
  0xb7   : > { %567 = vmatpush.msra.mxu0 %v496_v13  ;;  %v700_v13 = vld [vmem:[%s1326_s7 + $0x20] sm:$0xff] }
  0xb8   : > { %898 = vmatmul.msk.f32.vlgmr.msra.gmra.mxu0 %vm536_vm5, %v501_v12  ;;  %v699_v12 = vld [vmem:[%s1326_s7 + $0x18] sm:$0xff] }
  0xbd   : > { %v524_v25 = vpop.permute.xlu1 %523  ;;  %v622_v55 = vpop.permute.xlu0 %621 }
  0xc0   : > { %899 = vmatmul.msk.f32.gmra.mxu0 %vm536_vm5, %v502_v14 }
  0xc5   : > { %v632_v51 = vpop.permute.xlu1 %631 }
  0xc8   : > { %900 = vmatmul.msk.f32.gmra.mxu0 %vm536_vm5, %v503_v15 }
  0xcd   : > { %v617_v59 = vpop.permute.xlu1 %616 }
  0xd0   : > { %901 = vmatmul.msk.f32.gmra.mxu0 %vm536_vm5, %v504_v16 }
  0xd8   : > { %902 = vmatmul.msk.f32.gmra.mxu0 %vm536_vm5, %v505_v17  ;;  %v729_v17 = vpop.permute.xlu0 %728 }
 0x135   : > { %v569_v18 = vpop.f32.mrf.mxu0 }
 0x136   : > { %v570_v34 = vadd.f32 %v569_v18, %v514_v33 }
 0x138   : > { %v589_v40 = vmul.f32 0.01, %v570_v34  ;;  %vm584_vm10 = vcmp.ge.f32.partialorder %v570_v34, 0.0 }
 0x13a   : > { %v594_v43 = vsel %vm584_vm10, %v570_v34, %v589_v40 }
 0x13d   : > { %v572_v19 = vpop.f32.mrf.mxu0 }
 0x13e   : > { %v573_v30 = vadd.f32 %v572_v19, %v519_v29  ;;  %v724_v19 = vpop.permute.xlu1 %723 }
 0x140   : > { %v590_v38 = vmul.f32 0.01, %v573_v30  ;;  %vm585_vm9 = vcmp.ge.f32.partialorder %v573_v30, 0.0 }
 0x142   : > { %v595_v41 = vsel %vm585_vm9, %v573_v30, %v590_v38  ;;  %v793_v38 = vld [vmem:[%s1328_s9] sm:$0x1] }
 0x145   : > { %v575_v20 = vpop.f32.mrf.mxu0 }
 0x146   : > { %v576_v27 = vadd.f32 %v575_v20, %v524_v25  ;;  %v714_v25 = vpop.permute.xlu0 %713  ;;  %v709_v29 = vpop.permute.xlu1 %708 }
 0x148   : > { %v591_v36 = vmul.f32 0.01, %v576_v27  ;;  %vm586_vm8 = vcmp.ge.f32.partialorder %v576_v27, 0.0 }
 0x14a   : > { %v596_v39 = vsel %vm586_vm8, %v576_v27, %v591_v36 }
 0x14d   : > { %v578_v23 = vpop.f32.mrf.mxu0 }
 0x14e   : > { %v579_v24 = vadd.f32 %v578_v23, %v529_v22 }
 0x150   : > { %v592_v32 = vmul.f32 0.01, %v579_v24  ;;  %vm587_vm7 = vcmp.ge.f32.partialorder %v579_v24, 0.0 }
 0x152   : > { %v597_v37 = vsel %vm587_vm7, %v579_v24, %v592_v32 }
 0x155   : > { %v581_v26 = vpop.f32.mrf.mxu0 }
 0x156   : > { %v582_v28 = vadd.f32 %v581_v26, %v534_v21  ;;  %v719_v21 = vpop.permute.xlu2 %718 }
 0x158   : > { %vm588_vm6 = vcmp.ge.f32.partialorder %v582_v28, 0.0  ;;  %v593_v31 = vmul.f32 0.01, %v582_v28 }
 0x15a   : > { %v598_v35 = vsel %vm588_vm6, %v582_v28, %v593_v31 }
 0x15b   : > { %660 = vmatpush.msra.mxu1 %v598_v35 }
 0x15d   : > { %661 = vmatpush.msra.mxu1 %v597_v37 }
 0x15e   : > { %v798_v40 = vpop.permute.xlu2 %797 }
 0x15f   : > { %662 = vmatpush.msra.mxu1 %v596_v39 }
 0x161   : > { %663 = vmatpush.msra.mxu1 %v595_v41  ;;  %v800_v41 = vperm.slane %v798_v40, 0 }
 0x163   : > { %664 = vmatpush.msra.mxu1 %v594_v43 }
 0x164   : > { %903 = vmatmul.msk.f32.vlgmr.msra.gmra.mxu1 %vm536_vm5, %v599_v42 }
 0x16c   : > { %904 = vmatmul.msk.f32.gmra.mxu1 %vm536_vm5, %v600_v44 }
 0x174   : > { %905 = vmatmul.msk.f32.gmra.mxu1 %vm536_vm5, %v601_v45 }
 0x17c   : > { %906 = vmatmul.msk.f32.gmra.mxu1 %vm536_vm5, %v602_v46 }
 0x184   : > { %907 = vmatmul.msk.f32.gmra.mxu1 %vm536_vm5, %v603_v47 }
 0x1e1   : > { %v666_v48 = vpop.f32.mrf.mxu1 }
 0x1e2   : > { %v667_v0 = vadd.f32 %v666_v48, %v612_v63 }
 0x1e4   : > { %v686_v6 = vmul.f32 0.01, %v667_v0  ;;  %vm681_vm15 = vcmp.ge.f32.partialorder %v667_v0, 0.0 }
 0x1e6   : > { %v691_v9 = vsel %vm681_vm15, %v667_v0, %v686_v6 }
 0x1e9   : > { %v669_v49 = vpop.f32.mrf.mxu1 }
 0x1ea   : > { %v670_v60 = vadd.f32 %v669_v49, %v617_v59 }
 0x1ec   : > { %v687_v4 = vmul.f32 0.01, %v670_v60  ;;  %vm682_vm14 = vcmp.ge.f32.partialorder %v670_v60, 0.0 }
 0x1ee   : > { %v692_v7 = vsel %vm682_vm14, %v670_v60, %v687_v4 }
 0x1f1   : > { %v672_v50 = vpop.f32.mrf.mxu1 }
 0x1f2   : > { %v673_v57 = vadd.f32 %v672_v50, %v622_v55 }
 0x1f4   : > { %v688_v2 = vmul.f32 0.01, %v673_v57  ;;  %vm683_vm13 = vcmp.ge.f32.partialorder %v673_v57, 0.0 }
 0x1f6   : > { %v693_v5 = vsel %vm683_vm13, %v673_v57, %v688_v2 }
 0x1f9   : > { %v675_v52 = vpop.f32.mrf.mxu1 }
 0x1fa   : > { %v676_v54 = vadd.f32 %v675_v52, %v627_v53 }
 0x1fc   : > { %v689_v62 = vmul.f32 0.01, %v676_v54  ;;  %vm684_vm12 = vcmp.ge.f32.partialorder %v676_v54, 0.0 }
 0x1fe   : > { %v694_v3 = vsel %vm684_vm12, %v676_v54, %v689_v62 }
 0x201   : > { %v678_v56 = vpop.f32.mrf.mxu1 }
 0x202   : > { %v679_v58 = vadd.f32 %v678_v56, %v632_v51 }
 0x204   : > { %vm685_vm11 = vcmp.ge.f32.partialorder %v679_v58, 0.0  ;;  %v690_v61 = vmul.f32 0.01, %v679_v58 }
 0x206   : > { %v695_v1 = vsel %vm685_vm11, %v679_v58, %v690_v61 }
 0x207   : > { %757 = vmatpush.msra.mxu2 %v695_v1 }
 0x209   : > { %758 = vmatpush.msra.mxu2 %v694_v3 }
 0x20b   : > { %759 = vmatpush.msra.mxu2 %v693_v5 }
 0x20d   : > { %760 = vmatpush.msra.mxu2 %v692_v7 }
 0x20f   : > { %761 = vmatpush.msra.mxu2 %v691_v9 }
 0x210   : > { %908 = vmatmul.msk.f32.vlgmr.msra.gmra.mxu2 %vm536_vm5, %v696_v8 }
 0x218   : > { %909 = vmatmul.msk.f32.gmra.mxu2 %vm536_vm5, %v697_v10 }
 0x220   : > { %910 = vmatmul.msk.f32.gmra.mxu2 %vm536_vm5, %v698_v11 }
 0x228   : > { %911 = vmatmul.msk.f32.gmra.mxu2 %vm536_vm5, %v699_v12 }
 0x230   : > { %912 = vmatmul.msk.f32.gmra.mxu2 %vm536_vm5, %v700_v13 }
 0x293   : > { %v763_v14 = vpop.f32.mrf.mxu2 }
 0x294   : > { %v764_v30 = vadd.f32 %v763_v14, %v709_v29 }
 0x296   : > { %v783_v36 = vmul.f32 0.01, %v764_v30  ;;  %vm778_vm4 = vcmp.ge.f32.partialorder %v764_v30, 0.0 }
 0x298   : > { %v788_v39 = vsel %vm778_vm4, %v764_v30, %v783_v36 }
 0x29b   : > { %v766_v15 = vpop.f32.mrf.mxu2 }
 0x29c   : > { %v767_v26 = vadd.f32 %v766_v15, %v714_v25 }
 0x29e   : > { %v784_v34 = vmul.f32 0.01, %v767_v26  ;;  %vm779_vm3 = vcmp.ge.f32.partialorder %v767_v26, 0.0 }
 0x2a0   : > { %v789_v37 = vsel %vm779_vm3, %v767_v26, %v784_v34 }
 0x2a3   : > { %v769_v16 = vpop.f32.mrf.mxu2 }
 0x2a4   : > { %v770_v23 = vadd.f32 %v769_v16, %v719_v21 }
 0x2a6   : > { %v785_v32 = vmul.f32 0.01, %v770_v23  ;;  %vm780_vm2 = vcmp.ge.f32.partialorder %v770_v23, 0.0 }
 0x2a8   : > { %v790_v35 = vsel %vm780_vm2, %v770_v23, %v785_v32 }
 0x2ab   : > { %v772_v18 = vpop.f32.mrf.mxu2 }
 0x2ac   : > { %v773_v20 = vadd.f32 %v772_v18, %v724_v19 }
 0x2ae   : > { %v786_v28 = vmul.f32 0.01, %v773_v20  ;;  %vm781_vm1 = vcmp.ge.f32.partialorder %v773_v20, 0.0 }
 0x2b0   : > { %v791_v33 = vsel %vm781_vm1, %v773_v20, %v786_v28 }
 0x2b3   : > { %v775_v22 = vpop.f32.mrf.mxu2 }
 0x2b4   : > { %v776_v24 = vadd.f32 %v775_v22, %v729_v17 }
 0x2b6   : > { %vm782_vm0 = vcmp.ge.f32.partialorder %v776_v24, 0.0  ;;  %v787_v27 = vmul.f32 0.01, %v776_v24 }
 0x2b8   : > { %v792_v31 = vsel %vm782_vm0, %v776_v24, %v787_v27 }
 0x2b9   : > { %815 = vmatpush.msra.mxu3 %v792_v31 }
 0x2bb   : > { %816 = vmatpush.msra.mxu3 %v791_v33 }
 0x2bd   : > { %817 = vmatpush.msra.mxu3 %v790_v35 }
 0x2bf   : > { %818 = vmatpush.msra.mxu3 %v789_v37 }
 0x2c1   : > { %819 = vmatpush.msra.mxu3 %v788_v39 }
 0x2c2   : > { %913 = vmatmul.msk.f32.vlgmr.msra.gmra.mxu3 %vm536_vm5, %v793_v38 }
 0x345   : > { %v821_v42 = vpop.f32.mrf.mxu3 }
 0x346   : > { %v822_v43 = vadd.f32 %v821_v42, %v800_v41 }
 0x348   : > { %824 = vst [vmem:[%s378_s14] sm:$0x1] %v822_v43 }
 0x349   : > { %993 = shalt.err (!%p990_p3)
}
 0x34a   : > { %916 = dma.vmem_to_hbm [thread:$0]  (%p1133_p5), %s837_s15, 16, %s839_s16, %s826_s17  }
 0x34b PF: > { %p922_p4 = scmp.ge.s32.totalorder %s1028_s22, 2  ;;  %s850_s26 = sand.u32 1, %s1016_s19  }
 0x34c   : > { %s851_s14 = scalar_lea.sflag [#allocation4], %s850_s26 }
 0x34d   : > { %p919_p7 = pnand %p922_p4, %p1137_p6 }
 0x34f   : > { %p920_p8 = pneg %p919_p7 }
 0x351   : > { %1011 = dma.done.wait (%p920_p8), %s851_s14, 16  }
 0x352   : > { %1013 = vsyncadd (%p920_p8), %s851_s14, 4294967280  ;;  %p23_p9 = scmp.ge.s32.totalorder %s1120_s24, 4   ;;  %s1333_s19 = smov %s1020_s20 }
 0x353   : > { %s1334_s20 = smov %s1024_s21  ;;  %s1335_s21 = smov %s1131_s27 }
 0x354   : > { %s1336_s22 = smov %s1120_s24  ;;  %25 = sbr.rel (!%p23_p9) target bundleno = 6 (0x6), region = 99 }
 0x359   :  { %856 = vsyncpa [#allocation4], 1 }
 0x35a   :  { %858 = vsyncpa [#allocation4 + $0x1], 1 }

</bundles_post_ra>
